<compile_context>
chip_gen: v5e
topology: v5e:2x2
jax: 0.10.0
libtpu: 0.0.40
codegen_flags: <defaults>
</compile_context>

<pallas_src>
import numpy as np
import jax
import jax.numpy as jnp
from jax.experimental import pallas as pl
from jax.experimental.pallas import tpu as pltpu


# ----------------------------------------------------------------------------
# Filters and fused analysis matrices (deterministic, from the module's init).
# ----------------------------------------------------------------------------
def _db4_filters():
    s = np.sqrt(3.0)
    d = 4.0 * np.sqrt(2.0)
    h0 = np.array([(1 + s) / d, (3 + s) / d, (3 - s) / d, (1 - s) / d],
                  dtype=np.float32)
    h1 = np.array([((-1) ** k) * h0[3 - k] for k in range(4)], dtype=np.float32)
    return h0, h1


def _analysis_matrix(filt, L):
    """A[j, m] = sum_k [(2m + k - 1) mod L == j] * filt[k]  -> (L, L//2).

    Encodes circular pad (1, 2) + conv1d + stride-2 downsample exactly
    ('periodization' mode).
    """
    A = np.zeros((L, L // 2), dtype=np.float32)
    for m in range(L // 2):
        for k in range(4):
            A[(2 * m + k - 1) % L, m] += filt[k]
    return A


# TODO(synk): for large planes (H, W >= 512) the dense (W,W)/(H,H) matrices
# inflate MXU FLOPs by ~W/8 over the 4-tap band; a K-blocked band matmul
# (each 128/256-wide output chunk only contracts its ~260 dependent input
# columns) would cut MXU work ~4x at W=1024 and shrink the resident filter
# VMEM footprint from MiBs to KiBs.
def _fused_matrices(H, W):
    h0, h1 = _db4_filters()
    # Row (W-axis) transform, right-multiply: X @ [AW0 | AW1] -> [Lw | Hw]
    awcat = np.concatenate(
        [_analysis_matrix(h0, W), _analysis_matrix(h1, W)], axis=1)      # (W, W)
    # Column (H-axis) transform, left-multiply: [AH0^T; AH1^T] @ Xr
    ahcat_t = np.concatenate(
        [_analysis_matrix(h0, H).T, _analysis_matrix(h1, H).T], axis=0)  # (H, H)
    return jnp.asarray(awcat), jnp.asarray(ahcat_t)


# ----------------------------------------------------------------------------
# Pallas kernel: one DWT level on a block of TB (H, W) planes.
# ----------------------------------------------------------------------------
def _dwt2d_level_kernel(x_ref, awcat_ref, ahcat_t_ref, o_ref, xr_ref):
    TB, H, W = x_ref.shape
    h2, w2 = H // 2, W // 2

    aw = awcat_ref[...]        # (W, W)
    aht = ahcat_t_ref[...]     # (H, H)

    # Row (W-axis) transform.  When H % 8 == 0 the (TB,H,W)->(TB*H,W) reshape
    # is layout-free, so all TB planes share one wide matmul (big M toward the
    # MXU); the result is staged in VMEM scratch so the loop below only keeps
    # a single (H, W) plane live (bounded vreg pressure).
    fused_rows = (H % 8 == 0)
    if fused_rows:
        xr_ref[...] = jnp.dot(
            x_ref[...].reshape(TB * H, W), aw,
            preferred_element_type=jnp.float32).reshape(TB, H, W)

    # Constant quadrant-select mask, hoisted out of the per-plane loop.
    rows = jax.lax.broadcasted_iota(jnp.int32, (H, W), 0)
    cols = jax.lax.broadcasted_iota(jnp.int32, (H, W), 1)
    row_lo = rows < h2
    col_lo = cols < w2
    diag = (row_lo & col_lo) | (~row_lo & ~col_lo)

    def body(b, carry):
        if fused_rows:
            xr_b = xr_ref[b]                                   # (H, W) = [Lw|Hw]
        else:
            # Tiny sub-planes (H < 8): per-plane row matmul, no fused reshape.
            xr_b = jnp.dot(x_ref[b], aw, preferred_element_type=jnp.float32)
        # y = [[LL, HL], [LH, HH]]  (rows: low/high along H, cols: low/high
        # along W).  The stitched layout [LL|LH ; HL|HH] keeps the diagonal
        # quadrants and swaps the off-diagonal ones, which is exactly y rolled
        # circularly by (h2, w2): XLU rolls + a VPU select give ONE lane-dense
        # store per plane instead of 4 masked sub-tile stores.
        y = jnp.dot(aht, xr_b, preferred_element_type=jnp.float32)
        swapped = pltpu.roll(pltpu.roll(y, h2, axis=0), w2, axis=1)
        o_ref[b] = jnp.where(diag, y, swapped).astype(o_ref.dtype)
        return carry

    jax.lax.fori_loop(0, TB, body, 0, unroll=min(TB, 4))


# ----------------------------------------------------------------------------
# Wrapper: tiling choice + pallas_call.
# ----------------------------------------------------------------------------
def _choose_tb(N, H, W, target_bytes=4 << 20):
    """Planes per grid step.

    ~4 MiB of input planes per block (in/out double-buffers + xr scratch
    ~= 5x this, which fits every generation's VMEM once vmem_limit_bytes is
    raised; v7x is the smallest at 64 MiB physical).  Keep >= 2 grid steps
    when enough planes exist so ('parallel',) can spread across v7x's two
    TensorCores; this is harmless on single-core v5e/v6e at these block sizes.
    tb must divide N.
    """
    plane_bytes = H * W * 4
    tb = max(1, min(N, target_bytes // max(1, plane_bytes)))
    if N >= 4:
        tb = min(tb, N // 2)
    while N % tb:
        tb -= 1
    # Mild MXU-fill preference (256-wide MXU on v6e/v7x): make TB*H a multiple
    # of 256 if that costs at most half the block.
    if (tb * H) % 256 != 0:
        for d in range(tb - 1, 0, -1):
            if N % d == 0 and (d * H) % 256 == 0 and 2 * d >= tb:
                tb = d
                break
    return tb


def _dwt2d_level_pallas(x3, corner=None):
    """One DWT level over (N, H, W) planes -> stitched [LL|LH ; HL|HH].

    corner=None   : transform the full planes; returns a fresh (N, H, W) array.
    corner=(Hl,Wl): transform only the top-left (Hl, Wl) corner of each plane
                    in place (input_output_aliases); the untouched quadrants
                    are preserved.  Requires Hl % 8 == 0 and Wl % 128 == 0 so
                    corner blocks satisfy the (8,128) rule.
    """
    N, H, W = x3.shape
    Hl, Wl = (H, W) if corner is None else corner
    assert Hl % 2 == 0 and Wl % 2 == 0
    awcat, ahcat_t = _fused_matrices(Hl, Wl)
    tb = _choose_tb(N, Hl, Wl)

    block_bytes = tb * Hl * Wl * 4
    filt_bytes = (Hl * Hl + Wl * Wl) * 4
    # ~ 2x in + 2x out double buffers + xr scratch + filters + margin.
    vmem_need = 5 * block_bytes + 2 * filt_bytes + (4 << 20)
    vmem_limit = int(min(max(vmem_need, 32 << 20), 48 << 20))

    cost = pl.CostEstimate(
        flops=2 * N * Hl * Wl * (Hl + Wl),
        transcendentals=0,
        bytes_accessed=8 * N * Hl * Wl + 2 * filt_bytes)

    alias = {} if corner is None else {0: 0}

    return pl.pallas_call(
        _dwt2d_level_kernel,
        out_shape=jax.ShapeDtypeStruct((N, H, W), jnp.float32),
        grid_spec=pltpu.PrefetchScalarGridSpec(
            num_scalar_prefetch=0,
            grid=(N // tb,),
            in_specs=[
                pl.BlockSpec((tb, Hl, Wl), lambda i: (i, 0, 0)),
                pl.BlockSpec((Wl, Wl), lambda i: (0, 0)),
                pl.BlockSpec((Hl, Hl), lambda i: (0, 0)),
            ],
            out_specs=pl.BlockSpec((tb, Hl, Wl), lambda i: (i, 0, 0)),
            scratch_shapes=[pltpu.VMEM((tb, Hl, Wl), jnp.float32)],
        ),
        compiler_params=pltpu.CompilerParams(
            dimension_semantics=("parallel",),
            vmem_limit_bytes=vmem_limit),
        cost_estimate=cost,
        input_output_aliases=alias,
    )(x3, awcat, ahcat_t)


def wavelet_transform_forward(x, levels=1):
    """Equivalent of WaveletTransform(levels, mode='periodization').forward(x).

    x: (B, C, H, W) float32 with H, W divisible by 2**levels.
    """
    B, C, H, W = x.shape
    assert H % (2 ** levels) == 0 and W % (2 ** levels) == 0, \
        "H and W must be divisible by 2**levels"
    x3 = x.reshape(B * C, H, W).astype(jnp.float32)

    # Level 0 transforms the full planes; result is returned directly
    # (no extra wrapper copy for the common levels==1 case).
    out = _dwt2d_level_pallas(x3)
    for level in range(1, levels):
        Hl, Wl = H >> level, W >> level
        if Hl % 8 == 0 and Wl % 128 == 0:
            # In-place corner level via aliasing: no full-array slice / paste
            # HBM traffic for deeper levels.
            out = _dwt2d_level_pallas(out, corner=(Hl, Wl))
        else:
            # Small sub-planes: corner blocks would violate the (8,128) rule;
            # fall back to slice + paste (cheap at these sizes).
            sub = out[:, :Hl, :Wl]
            out = out.at[:, :Hl, :Wl].set(_dwt2d_level_pallas(sub))
    return out.reshape(B, C, H, W)


# ----------------------------------------------------------------------------
# Pure-JAX reference mirroring the PyTorch code op-for-op (validation only).
# ----------------------------------------------------------------------------
def _ref_dwt1d(x, h0, h1):
    L = x.shape[-1]
    xp = jnp.concatenate([x[..., L - 1:], x, x[..., :2]], axis=-1)
    low = sum(xp[..., k:k + L] * h0[k] for k in range(4))
    high = sum(xp[..., k:k + L] * h1[k] for k in range(4))
    return low[..., ::2], high[..., ::2]


def _ref_dwt2d(x, h0, h1):
    B, C, H, W = x.shape
    x_rows = jnp.transpose(x, (0, 2, 1, 3)).reshape(B * H, C, W)
    Lr, Hr = _ref_dwt1d(x_rows, h0, h1)
    Lr = jnp.transpose(Lr.reshape(B, H, C, W // 2), (0, 2, 1, 3))
    Hr = jnp.transpose(Hr.reshape(B, H, C, W // 2), (0, 2, 1, 3))
    Lc = jnp.transpose(Lr, (0, 3, 1, 2)).reshape(B * (W // 2), C, H)
    Hc = jnp.transpose(Hr, (0, 3, 1, 2)).reshape(B * (W // 2), C, H)
    LL, LH = _ref_dwt1d(Lc, h0, h1)
    HL, HH = _ref_dwt1d(Hc, h0, h1)
    fix = lambda t: jnp.transpose(t.reshape(B, W // 2, C, H // 2), (0, 2, 3, 1))
    return fix(LL), fix(LH), fix(HL), fix(HH)


def _ref_forward(x, levels):
    h0, h1 = _db4_filters()
    B, C, H, W = x.shape
    coeffs = {}
    cur = x
    LL = None
    for level in range(levels):
        LL, LH, HL, HH = _ref_dwt2d(cur, h0, h1)
        coeffs[f"LH_{level}"] = LH
        coeffs[f"HL_{level}"] = HL
        coeffs[f"HH_{level}"] = HH
        cur = LL
    coeffs["LL"] = LL
    out = jnp.zeros((B, C, H, W), x.dtype)
    size = coeffs["LL"].shape[-2:]
    out = out.at[..., : size[0], : size[1]].set(coeffs["LL"])
    for level in reversed(range(levels)):
        h, w = coeffs[f"HH_{level}"].shape[-2:]
        out = out.at[..., :h, size[1]:size[1] + w].set(coeffs[f"LH_{level}"])
        out = out.at[..., size[0]:size[0] + h, :w].set(coeffs[f"HL_{level}"])
        out = out.at[..., size[0]:size[0] + h,
                     size[1]:size[1] + w].set(coeffs[f"HH_{level}"])
        size = (size[0] + h, size[1] + w)
    return out


if __name__ == "__main__":
    # Case 1: module defaults (levels=1), small shape.
    B, C, H, W = 2, 4, 16, 16
    x = jax.random.normal(jax.random.PRNGKey(0), (B, C, H, W), dtype=jnp.float32)
    y = jax.block_until_ready(wavelet_transform_forward(x, levels=1))
    assert y.shape == (B, C, H, W) and y.dtype == jnp.float32
    y_ref = jax.block_until_ready(_ref_forward(x, 1))
    np.testing.assert_allclose(np.asarray(y), np.asarray(y_ref),
                               rtol=1e-5, atol=1e-5)

    # Case 2: levels=2, small planes (slice + paste sub-level path).
    x2 = jax.random.normal(jax.random.PRNGKey(1), (1, 2, 32, 32),
                           dtype=jnp.float32)
    fwd2 = jax.jit(lambda a: wavelet_transform_forward(a, levels=2))
    y2 = jax.block_until_ready(fwd2(x2))
    np.testing.assert_allclose(np.asarray(y2), np.asarray(_ref_forward(x2, 2)),
                               rtol=1e-5, atol=2e-5)

    # Case 3: levels=2 with a 128-aligned sub-plane -> exercises the
    # corner-addressed, aliased in-place level.
    x3 = jax.random.normal(jax.random.PRNGKey(2), (1, 2, 256, 256),
                           dtype=jnp.float32)
    fwd3 = jax.jit(lambda a: wavelet_transform_forward(a, levels=2))
    y3 = jax.block_until_ready(fwd3(x3))
    np.testing.assert_allclose(np.asarray(y3), np.asarray(_ref_forward(x3, 2)),
                               rtol=1e-5, atol=2e-5)

    print("KERNEL_OK")
</pallas_src>

<mosaic_0001>
module attributes {stable_mosaic.version = 11 : i64} {
  func.func @_dwt2d_level_kernel(%arg0: i32, %arg1: memref<4x16x16xf32, #tpu.memory_space<vmem>>, %arg2: memref<16x16xf32, #tpu.memory_space<vmem>>, %arg3: memref<16x16xf32, #tpu.memory_space<vmem>>, %arg4: memref<4x16x16xf32, #tpu.memory_space<vmem>>, %arg5: memref<4x16x16xf32, #tpu.memory_space<vmem>>) attributes {dimension_semantics = [#tpu.dimension_semantics<parallel>], iteration_bounds = array<i64: 2>, scalar_prefetch = 0 : i64, scratch_operands = 1 : i64, tpu.core_type = #tpu.core_type<tc>, window_params = [{transform_indices = @transform_0, window_bounds = array<i64: 4, 16, 16>}, {pipeline_mode = #tpu.pipeline_mode<synchronous>, transform_indices = @transform_1, window_bounds = array<i64: 16, 16>}, {pipeline_mode = #tpu.pipeline_mode<synchronous>, transform_indices = @transform_2, window_bounds = array<i64: 16, 16>}, {transform_indices = @transform_3, window_bounds = array<i64: 4, 16, 16>}]} {
    %c0 = arith.constant 0 : index
    %c0_0 = arith.constant 0 : index
    %0 = vector.load %arg2[%c0, %c0_0] : memref<16x16xf32, #tpu.memory_space<vmem>>, vector<16x16xf32>
    %c0_1 = arith.constant 0 : index
    %c0_2 = arith.constant 0 : index
    %1 = vector.load %arg3[%c0_1, %c0_2] : memref<16x16xf32, #tpu.memory_space<vmem>>, vector<16x16xf32>
    %c0_3 = arith.constant 0 : index
    %c0_4 = arith.constant 0 : index
    %c0_5 = arith.constant 0 : index
    %2 = vector.load %arg1[%c0_3, %c0_4, %c0_5] : memref<4x16x16xf32, #tpu.memory_space<vmem>>, vector<4x16x16xf32>
    %3 = vector.shape_cast %2 : vector<4x16x16xf32> to vector<64x16xf32>
    %cst = arith.constant dense<0.000000e+00> : vector<64x16xf32>
    %4 = tpu.matmul %3, %0, %cst {dimension_numbers = #tpu.dot_dimension_numbers<[1], [0], [0], [1], [0, 0, 1, 1], [], []>} : vector<64x16xf32>, vector<16x16xf32>, vector<64x16xf32> -> vector<64x16xf32>
    %5 = vector.shape_cast %4 : vector<64x16xf32> to vector<4x16x16xf32>
    %c0_6 = arith.constant 0 : index
    %c0_7 = arith.constant 0 : index
    %c0_8 = arith.constant 0 : index
    %6 = vector.load %arg5[%c0_6, %c0_7, %c0_8] : memref<4x16x16xf32, #tpu.memory_space<vmem>>, vector<4x16x16xf32>
    tpu.vector_store %arg5[%c0_6, %c0_7, %c0_8], %5 {strides = array<i32>} : memref<4x16x16xf32, #tpu.memory_space<vmem>>, vector<4x16x16xf32>,
    %7 = tpu.iota {dimensions = array<i32: 0>} : vector<16x16xi32>
    %8 = tpu.iota {dimensions = array<i32: 1>} : vector<16x16xi32>
    %c8_i32 = arith.constant 8 : i32
    %9 = vector.broadcast %c8_i32 : i32 to vector<16x16xi32>
    %10 = arith.cmpi slt, %7, %9 : vector<16x16xi32>
    %c8_i32_9 = arith.constant 8 : i32
    %11 = vector.broadcast %c8_i32_9 : i32 to vector<16x16xi32>
    %12 = arith.cmpi slt, %8, %11 : vector<16x16xi32>
    %13 = arith.andi %10, %12 : vector<16x16xi1>
    %cst_10 = arith.constant dense<true> : vector<16x16xi1>
    %14 = arith.xori %10, %cst_10 : vector<16x16xi1>
    %cst_11 = arith.constant dense<true> : vector<16x16xi1>
    %15 = arith.xori %12, %cst_11 : vector<16x16xi1>
    %16 = arith.andi %14, %15 : vector<16x16xi1>
    %17 = arith.ori %13, %16 : vector<16x16xi1>
    %c0_i32 = arith.constant 0 : i32
    %18 = arith.index_cast %c0_i32 : i32 to index
    %c0_12 = arith.constant 0 : index
    %c0_13 = arith.constant 0 : index
    %19 = vector.load %arg5[%18, %c0_12, %c0_13] : memref<4x16x16xf32, #tpu.memory_space<vmem>>, vector<1x16x16xf32>
    %20 = vector.shape_cast %19 : vector<1x16x16xf32> to vector<16x16xf32>
    %cst_14 = arith.constant dense<0.000000e+00> : vector<16x16xf32>
    %21 = tpu.matmul %1, %20, %cst_14 {dimension_numbers = #tpu.dot_dimension_numbers<[1], [0], [0], [1], [0, 0, 1, 1], [], []>} : vector<16x16xf32>, vector<16x16xf32>, vector<16x16xf32> -> vector<16x16xf32>
    %c8_i32_15 = arith.constant 8 : i32
    %22 = tpu.dynamic_rotate %21 by %c8_i32_15 dim 0 : vector<16x16xf32>, i32 -> vector<16x16xf32>
    %c8_i32_16 = arith.constant 8 : i32
    %23 = tpu.dynamic_rotate %22 by %c8_i32_16 dim 1 : vector<16x16xf32>, i32 -> vector<16x16xf32>
    %24 = arith.select %17, %21, %23 : vector<16x16xi1>, vector<16x16xf32>
    %25 = arith.index_cast %c0_i32 : i32 to index
    %c0_17 = arith.constant 0 : index
    %c0_18 = arith.constant 0 : index
    %26 = vector.load %arg4[%25, %c0_17, %c0_18] : memref<4x16x16xf32, #tpu.memory_space<vmem>>, vector<1x16x16xf32>
    %27 = vector.shape_cast %26 : vector<1x16x16xf32> to vector<16x16xf32>
    %28 = vector.shape_cast %24 : vector<16x16xf32> to vector<1x16x16xf32>
    tpu.vector_store %arg4[%25, %c0_17, %c0_18], %28 {strides = array<i32>} : memref<4x16x16xf32, #tpu.memory_space<vmem>>, vector<1x16x16xf32>,
    %c1_i32 = arith.constant 1 : i32
    %29 = arith.index_cast %c1_i32 : i32 to index
    %c0_19 = arith.constant 0 : index
    %c0_20 = arith.constant 0 : index
    %30 = vector.load %arg5[%29, %c0_19, %c0_20] : memref<4x16x16xf32, #tpu.memory_space<vmem>>, vector<1x16x16xf32>
    %31 = vector.shape_cast %30 : vector<1x16x16xf32> to vector<16x16xf32>
    %cst_21 = arith.constant dense<0.000000e+00> : vector<16x16xf32>
    %32 = tpu.matmul %1, %31, %cst_21 {dimension_numbers = #tpu.dot_dimension_numbers<[1], [0], [0], [1], [0, 0, 1, 1], [], []>} : vector<16x16xf32>, vector<16x16xf32>, vector<16x16xf32> -> vector<16x16xf32>
    %c8_i32_22 = arith.constant 8 : i32
    %33 = tpu.dynamic_rotate %32 by %c8_i32_22 dim 0 : vector<16x16xf32>, i32 -> vector<16x16xf32>
    %c8_i32_23 = arith.constant 8 : i32
    %34 = tpu.dynamic_rotate %33 by %c8_i32_23 dim 1 : vector<16x16xf32>, i32 -> vector<16x16xf32>
    %35 = arith.select %17, %32, %34 : vector<16x16xi1>, vector<16x16xf32>
    %36 = arith.index_cast %c1_i32 : i32 to index
    %c0_24 = arith.constant 0 : index
    %c0_25 = arith.constant 0 : index
    %37 = vector.load %arg4[%36, %c0_24, %c0_25] : memref<4x16x16xf32, #tpu.memory_space<vmem>>, vector<1x16x16xf32>
    %38 = vector.shape_cast %37 : vector<1x16x16xf32> to vector<16x16xf32>
    %39 = vector.shape_cast %35 : vector<16x16xf32> to vector<1x16x16xf32>
    tpu.vector_store %arg4[%36, %c0_24, %c0_25], %39 {strides = array<i32>} : memref<4x16x16xf32, #tpu.memory_space<vmem>>, vector<1x16x16xf32>,
    %c2_i32 = arith.constant 2 : i32
    %40 = arith.index_cast %c2_i32 : i32 to index
    %c0_26 = arith.constant 0 : index
    %c0_27 = arith.constant 0 : index
    %41 = vector.load %arg5[%40, %c0_26, %c0_27] : memref<4x16x16xf32, #tpu.memory_space<vmem>>, vector<1x16x16xf32>
    %42 = vector.shape_cast %41 : vector<1x16x16xf32> to vector<16x16xf32>
    %cst_28 = arith.constant dense<0.000000e+00> : vector<16x16xf32>
    %43 = tpu.matmul %1, %42, %cst_28 {dimension_numbers = #tpu.dot_dimension_numbers<[1], [0], [0], [1], [0, 0, 1, 1], [], []>} : vector<16x16xf32>, vector<16x16xf32>, vector<16x16xf32> -> vector<16x16xf32>
    %c8_i32_29 = arith.constant 8 : i32
    %44 = tpu.dynamic_rotate %43 by %c8_i32_29 dim 0 : vector<16x16xf32>, i32 -> vector<16x16xf32>
    %c8_i32_30 = arith.constant 8 : i32
    %45 = tpu.dynamic_rotate %44 by %c8_i32_30 dim 1 : vector<16x16xf32>, i32 -> vector<16x16xf32>
    %46 = arith.select %17, %43, %45 : vector<16x16xi1>, vector<16x16xf32>
    %47 = arith.index_cast %c2_i32 : i32 to index
    %c0_31 = arith.constant 0 : index
    %c0_32 = arith.constant 0 : index
    %48 = vector.load %arg4[%47, %c0_31, %c0_32] : memref<4x16x16xf32, #tpu.memory_space<vmem>>, vector<1x16x16xf32>
    %49 = vector.shape_cast %48 : vector<1x16x16xf32> to vector<16x16xf32>
    %50 = vector.shape_cast %46 : vector<16x16xf32> to vector<1x16x16xf32>
    tpu.vector_store %arg4[%47, %c0_31, %c0_32], %50 {strides = array<i32>} : memref<4x16x16xf32, #tpu.memory_space<vmem>>, vector<1x16x16xf32>,
    %c3_i32 = arith.constant 3 : i32
    %51 = arith.index_cast %c3_i32 : i32 to index
    %c0_33 = arith.constant 0 : index
    %c0_34 = arith.constant 0 : index
    %52 = vector.load %arg5[%51, %c0_33, %c0_34] : memref<4x16x16xf32, #tpu.memory_space<vmem>>, vector<1x16x16xf32>
    %53 = vector.shape_cast %52 : vector<1x16x16xf32> to vector<16x16xf32>
    %cst_35 = arith.constant dense<0.000000e+00> : vector<16x16xf32>
    %54 = tpu.matmul %1, %53, %cst_35 {dimension_numbers = #tpu.dot_dimension_numbers<[1], [0], [0], [1], [0, 0, 1, 1], [], []>} : vector<16x16xf32>, vector<16x16xf32>, vector<16x16xf32> -> vector<16x16xf32>
    %c8_i32_36 = arith.constant 8 : i32
    %55 = tpu.dynamic_rotate %54 by %c8_i32_36 dim 0 : vector<16x16xf32>, i32 -> vector<16x16xf32>
    %c8_i32_37 = arith.constant 8 : i32
    %56 = tpu.dynamic_rotate %55 by %c8_i32_37 dim 1 : vector<16x16xf32>, i32 -> vector<16x16xf32>
    %57 = arith.select %17, %54, %56 : vector<16x16xi1>, vector<16x16xf32>
    %58 = arith.index_cast %c3_i32 : i32 to index
    %c0_38 = arith.constant 0 : index
    %c0_39 = arith.constant 0 : index
    %59 = vector.load %arg4[%58, %c0_38, %c0_39] : memref<4x16x16xf32, #tpu.memory_space<vmem>>, vector<1x16x16xf32>
    %60 = vector.shape_cast %59 : vector<1x16x16xf32> to vector<16x16xf32>
    %61 = vector.shape_cast %57 : vector<16x16xf32> to vector<1x16x16xf32>
    tpu.vector_store %arg4[%58, %c0_38, %c0_39], %61 {strides = array<i32>} : memref<4x16x16xf32, #tpu.memory_space<vmem>>, vector<1x16x16xf32>,
    %c4_i32 = arith.constant 4 : i32
    return
  }
  func.func @transform_0(%arg0: i32) -> (i32, i32, i32) {
    %c0_i32 = arith.constant 0 : i32
    %c0_i32_0 = arith.constant 0 : i32
    %c0_i32_1 = arith.constant 0 : i32
    return %arg0, %c0_i32, %c0_i32_0 : i32, i32, i32
  }
  func.func @transform_1(%arg0: i32) -> (i32, i32) {
    %c0_i32 = arith.constant 0 : i32
    %c0_i32_0 = arith.constant 0 : i32
    %c0_i32_1 = arith.constant 0 : i32
    return %c0_i32, %c0_i32_0 : i32, i32
  }
  func.func @transform_2(%arg0: i32) -> (i32, i32) {
    %c0_i32 = arith.constant 0 : i32
    %c0_i32_0 = arith.constant 0 : i32
    %c0_i32_1 = arith.constant 0 : i32
    return %c0_i32, %c0_i32_0 : i32, i32
  }
  func.func @transform_3(%arg0: i32) -> (i32, i32, i32) {
    %c0_i32 = arith.constant 0 : i32
    %c0_i32_0 = arith.constant 0 : i32
    %c0_i32_1 = arith.constant 0 : i32
    return %arg0, %c0_i32, %c0_i32_0 : i32, i32, i32
  }
}

</mosaic_0001>

<bundles_post_ra>
// kernel: tpu_custom_call.1
= control target key start
LH: loop header
LB: loop body
LE: loop exit
PB: predicated region body
PF: predicated region fallthrough
CT: control target
= control target key end

     0   :  { %8 = vsyncpa [#allocation4], 0  ;;  %s1246_s0 = inlined_call_operand.hbm [shape: f32[8,16,16], index: 0, kind: input, shape index: {}]   ;;  %s1247_s1 = inlined_call_operand.hbm [shape: f32[16,16], index: 1, kind: input, shape index: {}]   ;;  %s1248_s2 = inlined_call_operand.hbm [shape: f32[16,16], index: 2, kind: input, shape index: {}]   ;;  %s1249_s3 = inlined_call_operand.hbm [shape: f32[8,16,16], index: 3, kind: output, shape index: {}]  }
   0x1   :  { %10 = vsyncpa [#allocation4 + $0x1], 0 }
   0x2   :  { %11 = vsyncpa [#allocation7], 0 }
   0x3   :  { %12 = vsyncpa [#allocation5], 0 }
   0x4   :  { %14 = vsyncpa [#allocation5 + $0x1], 0  ;;  %s963_s12 = smov 0   ;;  %s965_s13 = smov 0  }
   0x5   :  { %s967_s14 = smov 0   ;;  %s969_s15 = smov 0  }
   0x6 LB: > { %s984_s16 = sadd.s32 4294967295, %s932_s15   ;;  %s648_s17 = sadd.s32 4294967294, %s932_s15   ;;  %s932_s15 = sphi %s969_s15, %s1261_s15   ;;  %s928_s14 = sphi %s967_s14, %s1260_s14   ;;  %s924_s13 = sphi %s965_s13, %s1259_s13   ;;  %s920_s12 = sphi %s963_s12, %s1258_s12  }
   0x7   : > { %p40_p0 = scmp.ne.s32.totalorder %s924_s13, %s920_s12  ;;  %p41_p1 = scmp.eq.s32.totalorder %s984_s16, 0 }
   0x8   : > { %p106_p2 = scmp.eq.s32.totalorder %s984_s16, 1  ;;  %p112_p3 = scmp.eq.s32.totalorder %s648_s17, 1 }
   0x9   : > { %p993_p4 = por %p41_p1, %p40_p0  ;;  %p649_p5 = scmp.ge.s32.totalorder %s932_s15, 1 }
   0xa   : > { %p998_p6 = por %p112_p3, %p40_p0  ;;  %p119_p7 = scmp.lt.s32.totalorder %s932_s15, 3 }
   0xb   : > { %s130_s22 = sshll.u32 %s1247_s1, 4  ;;  %s934_s24 = smov [#allocation6]   ;;  %s131_s22 = int_to_ptr.hbm [resolvable:$true] %s130_s22 }
   0xc   : > { %p1006_p8 = pnand %p649_p5, %p119_p7  ;;  %s132_s25 = sshll.u32 %s934_s24, 4  ;;  %s133_s25 = int_to_ptr.vmem [resolvable:$true] %s132_s25 }
   0xd   : > { %s144_s28 = sshll.u32 %s1248_s2, 4  ;;  %s935_s29 = smov 128   ;;  %s145_s28 = int_to_ptr.hbm [resolvable:$true] %s144_s28 }
   0xe   : > { %p710_p9 = pneg %p1006_p8  ;;  %s936_s30 = smov 8  }
   0xf   : > { %s937_s4 = smov [#allocation8]   ;;  %s1025_s6 = sadd.s32 1, %s932_s15  }
  0x10   : > { %p711_p10 = pnand %p710_p9, %p41_p1  ;;  %s146_s5 = sshll.u32 %s937_s4, 4  ;;  %s147_s5 = int_to_ptr.vmem [resolvable:$true] %s146_s5 }
  0x11   : > { %s27_s7 = sadd.s32 1, %s928_s14  ;;  %s24_s8 = ssub.s32 %s932_s15, %s1025_s6 }
  0x12   : > { %713 = dma.hbm_to_vmem [thread:$0]  (!%p711_p10), %s131_s22, 256, %s133_s25, [#allocation7], %s935_s29, %s935_s29, %s936_s30  }
  0x13   : > { %716 = dma.hbm_to_vmem [thread:$0]  (!%p711_p10), %s145_s28, 256, %s147_s5, [#allocation7], %s935_s29, %s935_s29, %s936_s30  }
  0x14   : > { %p34_p12 = scmp.ne.s32.totalorder %s928_s14, %s924_s13  ;;  %p25_p13 = scmp.eq.s32.totalorder %s24_s8, 0 }
  0x15   : > { %p35_p0 = scmp.eq.s32.totalorder %s932_s15, 0  ;;  %p727_p5 = scmp.lt.s32.totalorder %s932_s15, 2 }
  0x16   : > { %p1035_p3 = por %p106_p2, %p34_p12  ;;  %s160_s11 = sand.u32 1, %s928_s14  }
  0x17   : > { %s1041_s10 = scalar_select %p25_p13, %s928_s14, %s27_s7  }
  0x18   : > { %p36_p7 = por %p35_p0, %p34_p12  ;;  %s653_s17 = sshll.u32 %s160_s11, 6 }
  0x19   : > { %s691_s20 = sshll.u32 %s932_s15, 6  ;;  %s164_s25 = scalar_lea.vmem [#allocation3], %s653_s17 }
  0x1a   : > { %s170_s24 = scalar_lea.hbm %s1246_s0, %s691_s20  ;;  %s173_s26 = sshll.u32 %s164_s25, 4  ;;  %s174_s26 = int_to_ptr.vmem [resolvable:$true] %s173_s26 }
  0x1b   : > { %s171_s27 = sshll.u32 %s170_s24, 4  ;;  %p1048_p2 = pnand %p727_p5, %p36_p7  ;;  %s172_s27 = int_to_ptr.hbm [resolvable:$true] %s171_s27 }
  0x1c   : > { %s161_s4 = scalar_lea.sflag [#allocation4], %s160_s11  ;;  %s832_s5 = sshra.s32 %s172_s27, 4  ;;  %s833_s5 = int_to_ptr.hbm [resolvable:$true] %s832_s5 }
  0x1d   : > { %s834_s7 = scalar_lea.hbm %s833_s5, 64  ;;  %p836_p10 = pneg %p1048_p2 }
  0x1e   : > { %p835_p9 = scmp.ne.s32.totalorder %s833_s5, %s834_s7  ;;  %s839_s20 = scalar_lea.hbm %s1246_s0, 128 }
  0x1f   : > { %p840_p0 = scmp.lt.s32.totalorder %s833_s5, %s1246_s0  ;;  %p841_p5 = scmp.lt.s32.totalorder %s839_s20, %s834_s7 }
  0x20   : > { %p837_p12 = pnand %p836_p10, %p835_p9 }
  0x21   : > { %p842_p7 = por %p841_p5, %p840_p0 }
  0x22   : > { %p838_p13 = pneg %p837_p12 }
  0x24   : > { %p843_p11 = pnand %p842_p7, %p838_p13 }
  0x26   : > { %846 = shalt.err (!%p843_p11)
}
  0x27   : > { %720 = dma.hbm_to_vmem [thread:$0]  (!%p1048_p2), %s172_s27, 1024, %s174_s26, %s161_s4, %s935_s29, %s935_s29, %s936_s30  }
  0x28   : > { %185 = sbr.rel (%p1006_p8) target bundleno = 713 (0x2c9), region = 32  ;;  %s1068_s11 = sand.u32 (!%p1006_p8), 1, %s924_s13  }
  0x29   : > { %s658_s24 = sshll.u32 (!%p1006_p8), %s1068_s11, 6  ;;  %s188_s25 = scalar_lea.sflag (!%p1006_p8), [#allocation4], %s1068_s11 }
  0x2a   : > { %s191_s5 = scalar_lea.vmem (!%p1006_p8), [#allocation3], %s658_s24 }
  0x2d   : > { %907 = dma.done.wait (%p993_p4), %s188_s25, 1024  }
  0x2e   : > { %909 = vsyncadd (%p993_p4), %s188_s25, 4294966272 }
  0x2f   : > { %911 = dma.done.wait (%p41_p1), [#allocation7], 512  }
  0x30   : > { %913 = vsyncadd (%p41_p1), [#allocation7], 4294966784  ;;  %v228_v0 = vld [vmem:[#allocation6 + $0x8] sm:$0xff]  ;;  %v227_v1 = vld [vmem:[#allocation6] sm:$0xff]  ;;  %vm239_vm0 = vcmask 130048   ;;  %s938_s18 = smov 16  }
  0x31   : > { %278 = vmatpush.msra.mxu0 %v228_v0  ;;  %694 = vmatpush.msra.mxu2 %v228_v0  ;;  %v231_v2 = vld [vmem:[%s191_s5] sm:$0xff]  ;;  %v237_v4 = vld [vmem:[%s191_s5 + $0x30] sm:$0xff]  ;;  %v232_v5 = vld [vmem:[%s191_s5 + $0x8] sm:$0xff]  ;;  %vm361_vm1 = vcmask 1047680   ;;  %s939_s23 = smov 120   ;;  %vm940_vm3 = vmmov 1  }
  0x32   : > { %v235_v3 = vld [vmem:[%s191_s5 + $0x20] sm:$0xff]  ;;  %695 = vmatpush.msra.mxu3 %v228_v0  ;;  %v236_v6 = vld [vmem:[%s191_s5 + $0x28] sm:$0xff]  ;;  %v238_v7 = vld [vmem:[%s191_s5 + $0x38] sm:$0xff]  ;;  %s224_s29 = scalar_lea.vmem [#allocation9], %s658_s24  ;;  %s693_s30 = sshll.u32 %s984_s16, 6 }
  0x33   : > { %279 = vmatpush.msra.mxu0 %v227_v1  ;;  %696 = vmatpush.msra.mxu2 %v227_v1  ;;  %v233_v8 = vld [vmem:[%s191_s5 + $0x10] sm:$0xff]  ;;  %v234_v9 = vld [vmem:[%s191_s5 + $0x18] sm:$0xff]  ;;  %s552_s28 = scalar_lea.hbm %s1249_s3, %s693_s30  ;;  %s553_s4 = sshll.u32 %s224_s29, 4  ;;  %s554_s4 = int_to_ptr.vmem [resolvable:$true] %s553_s4 }
  0x34   : > { %662 = vmatmul.msk.f32.vlgmr.msra.gmra.mxu0 %vm239_vm0, %v231_v2  ;;  %666 = vmatmul.msk.f32.vlgmr.msra.gmra.mxu2 %vm239_vm0, %v235_v3  ;;  %v229_v18 = vld [vmem:[#allocation8] sm:$0xff]  ;;  %v230_v23 = vld [vmem:[#allocation8 + $0x8] sm:$0xff]  ;;  %s555_s7 = sshll.u32 %s552_s28, 4  ;;  %s540_s16 = scalar_lea.sflag [#allocation5], %s1068_s11  ;;  %s556_s7 = int_to_ptr.hbm [resolvable:$true] %s555_s7 }
  0x35   : > { %697 = vmatpush.msra.mxu3 %v227_v1  ;;  %s876_s8 = sshra.s32 %s556_s7, 4  ;;  %s882_s22 = scalar_lea.hbm %s1249_s3, 128  ;;  %s877_s8 = int_to_ptr.hbm [resolvable:$true] %s876_s8 }
  0x36   : > { %668 = vmatmul.msk.f32.vlgmr.msra.gmra.mxu3 %vm239_vm0, %v237_v4  ;;  %v316_v4 = vlaneseq  ;;  %s878_s17 = scalar_lea.hbm %s877_s8, 64  ;;  %p883_p11 = scmp.lt.s32.totalorder %s877_s8, %s1249_s3 }
  0x37   : > { %p879_p1 = scmp.ne.s32.totalorder %s877_s8, %s878_s17  ;;  %p884_p2 = scmp.lt.s32.totalorder %s882_s22, %s878_s17 }
  0x39   : > { %p880_p4 = pnand %p879_p1, %p1035_p3  ;;  %p885_p9 = por %p884_p2, %p883_p11 }
  0x3b   : > { %p881_p8 = pneg %p880_p4 }
  0x3c   : > { %663 = vmatmul.msk.f32.gmra.mxu0 %vm239_vm0, %v232_v5  ;;  %667 = vmatmul.msk.f32.gmra.mxu2 %vm239_vm0, %v236_v6  ;;  %v317_v5 = vand.u32 127, %v316_v4 }
  0x3d   : > { %p886_p10 = pnand %p885_p9, %p881_p8 }
  0x3e   : > { %669 = vmatmul.msk.f32.gmra.mxu3 %vm239_vm0, %v238_v7  ;;  %vm320_vm2 = vcmp.lt.s32.totalorder %v317_v5, 8 }
  0x3f   : > { %vm1179_vm4 = vmxor %vm320_vm2, %vm940_vm3 }
  0x44   : > { %664 = vmatmul.msk.f32.gmra.mxu0 %vm239_vm0, %v233_v8 }
  0x4c   : > { %665 = vmatmul.msk.f32.gmra.mxu0 %vm239_vm0, %v234_v9 }
  0xb1   : > { %v281_v10 = vpop.f32.mrf.mxu0 }
  0xb2   : > { %305 = vst.msk [vmem:[#allocation2] sm:$0xff] %vm239_vm0, %v281_v10 }
  0xb7   : > { %v293_v11 = vpop.f32.mrf.mxu2 }
  0xb8   : > { %309 = vst.msk [vmem:[#allocation2 + $0x20] sm:$0xff] %vm239_vm0, %v293_v11 }
  0xb9   : > { %v284_v12 = vpop.f32.mrf.mxu0  ;;  %v299_v13 = vpop.f32.mrf.mxu3  ;;  %v330_v19 = vld [vmem:[#allocation2] sm:$0xff] }
  0xba   : > { %306 = vst.msk [vmem:[#allocation2 + $0x8] sm:$0xff] %vm239_vm0, %v284_v12 }
  0xbb   : > { %311 = vst.msk [vmem:[#allocation2 + $0x30] sm:$0xff] %vm239_vm0, %v299_v13 }
  0xbf   : > { %v296_v14 = vpop.f32.mrf.mxu2  ;;  %v438_v21 = vld [vmem:[#allocation2 + $0x20] sm:$0xff] }
  0xc0   : > { %310 = vst.msk [vmem:[#allocation2 + $0x28] sm:$0xff] %vm239_vm0, %v296_v14 }
  0xc1   : > { %v287_v15 = vpop.f32.mrf.mxu0  ;;  %v331_v16 = vld [vmem:[#allocation2 + $0x8] sm:$0xff]  ;;  %v302_v17 = vpop.f32.mrf.mxu3 }
  0xc2   : > { %307 = vst.msk [vmem:[#allocation2 + $0x10] sm:$0xff] %vm239_vm0, %v287_v15  ;;  %352 = vmatpush.msra.mxu1 %v331_v16  ;;  %v489_v25 = vld [vmem:[#allocation2 + $0x30] sm:$0xff] }
  0xc3   : > { %312 = vst.msk [vmem:[#allocation2 + $0x38] sm:$0xff] %vm239_vm0, %v302_v17 }
  0xc4   : > { %353 = vmatpush.msra.mxu1 %v330_v19 }
  0xc5   : > { %670 = vmatmul.msk.f32.vlgmr.msra.gmra.mxu1 %vm239_vm0, %v229_v18 }
  0xc7   : > { %v439_v20 = vld [vmem:[#allocation2 + $0x28] sm:$0xff] }
  0xc8   : > { %454 = vmatpush.msrb.mxu3 %v439_v20 }
  0xc9   : > { %v290_v22 = vpop.f32.mrf.mxu0  ;;  %v387_v27 = vld [vmem:[#allocation2 + $0x10] sm:$0xff] }
  0xca   : > { %308 = vst.msk [vmem:[#allocation2 + $0x18] sm:$0xff] %vm239_vm0, %v290_v22  ;;  %455 = vmatpush.msrb.mxu3 %v438_v21  ;;  %v490_v24 = vld [vmem:[#allocation2 + $0x38] sm:$0xff] }
  0xcb   : > { %676 = vmatmul.msk.f32.vlgmr.msrb.gmra.mxu3 %vm239_vm0, %v229_v18  ;;  %505 = vmatpush.msrb.mxu1 %v490_v24 }
  0xcd   : > { %671 = vmatmul.msk.f32.gmra.mxu1 %vm239_vm0, %v230_v23 }
  0xce   : > { %506 = vmatpush.msrb.mxu1 %v489_v25 }
  0xd1   : > { %v388_v26 = vld [vmem:[#allocation2 + $0x18] sm:$0xff] }
  0xd2   : > { %403 = vmatpush.msrb.mxu2 %v388_v26 }
  0xd3   : > { %677 = vmatmul.msk.f32.gmra.mxu3 %vm239_vm0, %v230_v23 }
  0xd4   : > { %404 = vmatpush.msrb.mxu2 %v387_v27 }
  0xd5   : > { %672 = vmatmul.msk.f32.vlgmr.msrb.gmra.mxu2 %vm239_vm0, %v229_v18  ;;  %680 = vmatmul.msk.f32.vlgmr.msrb.gmra.mxu1 %vm239_vm0, %v229_v18 }
  0xdd   : > { %673 = vmatmul.msk.f32.gmra.mxu2 %vm239_vm0, %v230_v23  ;;  %681 = vmatmul.msk.f32.gmra.mxu1 %vm239_vm0, %v230_v23 }
 0x142   : > { %v1106_v28 = vpop.f32.mrf.mxu1 }
 0x143   : > { %365 = vrot.lane.b32.xlu0 %v1106_v28, %s938_s18 }
 0x14a   : > { %v1110_v29 = vpop.f32.mrf.mxu1 }
 0x14b   : > { %362 = vrot.lane.b32.xlu0 %v1110_v29, %s938_s18 }
 0x14e   : > { %v1114_v30 = vpop.f32.mrf.mxu3 }
 0x152   : > { %v1116_v31 = vpop.f32.mrf.mxu1 }
 0x156   : > { %v1118_v32 = vpop.f32.mrf.mxu3 }
 0x157   : > { %463 = vrot.lane.b32.xlu2 %v1118_v32, %s938_s18 }
 0x158   : > { %v1122_v33 = vpop.f32.mrf.mxu2 }
 0x159   : > { %415 = vrot.lane.b32.xlu1 %v1122_v33, %s938_s18 }
 0x15a   : > { %v1126_v34 = vpop.f32.mrf.mxu1 }
 0x15b   : > { %514 = vrot.lane.b32.xlu0 %v1126_v34, %s938_s18 }
 0x15f   : > { %466 = vrot.lane.b32.xlu2 %v1114_v30, %s938_s18 }
 0x160   : > { %v1132_v35 = vpop.f32.mrf.mxu2 }
 0x161   : > { %412 = vrot.lane.b32.xlu1 %v1132_v35, %s938_s18 }
 0x169   : > { %517 = vrot.lane.b32.xlu1 %v1116_v31, %s938_s18 }
 0x1b1   : > { %v464_v38 = vpop.permute.xlu2 %463 }
 0x1b2   : > { %v465_v41 = vsel %vm361_vm1, %v464_v38, %v1118_v32 }
 0x1b5   : > { %v366_v36 = vpop.permute.xlu0 %365 }
 0x1b6   : > { %v367_v37 = vsel %vm361_vm1, %v366_v36, %v1106_v28 }
 0x1b7   : > { %370 = vrot.lane.b32.xlu0 %v367_v37, %s938_s18 }
 0x1b9   : > { %v467_v48 = vpop.permute.xlu2 %466 }
 0x1ba   : > { %v468_v50 = vsel %vm361_vm1, %v467_v48, %v1114_v30 }
 0x1bd   : > { %v363_v39 = vpop.permute.xlu0 %362 }
 0x1be   : > { %v364_v40 = vsel %vm361_vm1, %v363_v39, %v1110_v29 }
 0x1bf   : > { %368 = vrot.lane.b32.xlu2 %v364_v40, %s938_s18  ;;  %469 = vrot.lane.b32.xlu0 %v465_v41, %s938_s18 }
 0x1cb   : > { %v416_v42 = vpop.permute.xlu1 %415 }
 0x1cc   : > { %v417_v43 = vsel %vm361_vm1, %v416_v42, %v1122_v33 }
 0x1cd   : > { %420 = vrot.lane.b32.xlu2 %v417_v43, %s938_s18  ;;  %v515_v44 = vpop.permute.xlu0 %514 }
 0x1ce   : > { %v516_v46 = vsel %vm361_vm1, %v515_v44, %v1126_v34 }
 0x1d3   : > { %v413_v45 = vpop.permute.xlu1 %412 }
 0x1d4   : > { %v414_v47 = vsel %vm361_vm1, %v413_v45, %v1132_v35 }
 0x1d5   : > { %520 = vrot.lane.b32.xlu2 %v516_v46, %s938_s18  ;;  %418 = vrot.lane.b32.xlu1 %v414_v47, %s938_s18 }
 0x1db   : > { %v518_v49 = vpop.permute.xlu1 %517 }
 0x1dc   : > { %v519_v51 = vsel %vm361_vm1, %v518_v49, %v1116_v31 }
 0x1dd   : > { %471 = vrot.lane.b32.xlu1 %v468_v50, %s938_s18  ;;  %522 = vrot.lane.b32.xlu0 %v519_v51, %s938_s18 }
 0x219   : > { %v369_v52 = vpop.permute.xlu2 %368 }
 0x21a   : > { %v372_v53 = vsel %vm361_vm1, %v369_v52, %v1110_v29 }
 0x21b   : > { %376 = vrot.lane.b32.xlu1 %v372_v53, %s939_s23 }
 0x227   : > { %v421_v54 = vpop.permute.xlu2 %420 }
 0x228   : > { %v423_v55 = vsel %vm361_vm1, %v421_v54, %v1122_v33 }
 0x229   : > { %v371_v56 = vpop.permute.xlu0 %370  ;;  %428 = vrot.lane.b32.xlu1 %v423_v55, %s939_s23 }
 0x22a   : > { %v373_v57 = vsel %vm361_vm1, %v371_v56, %v1106_v28 }
 0x22b   : > { %378 = vrot.lane.b32.xlu2 %v373_v57, %s939_s23 }
 0x22f   : > { %v521_v58 = vpop.permute.xlu2 %520 }
 0x230   : > { %v524_v59 = vsel %vm361_vm1, %v521_v58, %v1126_v34 }
 0x231   : > { %v470_v60 = vpop.permute.xlu0 %469  ;;  %528 = vrot.lane.b32.xlu1 %v524_v59, %s939_s23 }
 0x232   : > { %v473_v61 = vsel %vm361_vm1, %v470_v60, %v1118_v32 }
 0x233   : > { %477 = vrot.lane.b32.xlu2 %v473_v61, %s939_s23 }
 0x247   : > { %v419_v62 = vpop.permute.xlu1 %418 }
 0x248   : > { %v422_v63 = vsel %vm361_vm1, %v419_v62, %v1132_v35 }
 0x249   : > { %426 = vrot.lane.b32.xlu0 %v422_v63, %s939_s23 }
 0x24f   : > { %v523_v0 = vpop.permute.xlu0 %522  ;;  %v472_v1 = vpop.permute.xlu1 %471 }
 0x250   : > { %v525_v2 = vsel %vm361_vm1, %v523_v0, %v1116_v31  ;;  %v474_v3 = vsel %vm361_vm1, %v472_v1, %v1114_v30 }
 0x251   : > { %530 = vrot.lane.b32.xlu2 %v525_v2, %s939_s23  ;;  %479 = vrot.lane.b32.xlu0 %v474_v3, %s939_s23 }
 0x285   : > { %v379_v7 = vpop.permute.xlu2 %378 }
 0x286   : > { %v383_v8 = vsel %vm1179_vm4, %v1110_v29, %v379_v7 }
 0x287   : > { %385 = vst.msk [vmem:[%s224_s29 + $0x8] sm:$0xff] %vm239_vm0, %v383_v8 }
 0x28d   : > { %v478_v9 = vpop.permute.xlu2 %477  ;;  %v377_v10 = vpop.permute.xlu1 %376 }
 0x28e   : > { %v483_v11 = vsel %vm320_vm2, %v1114_v30, %v478_v9  ;;  %v382_v12 = vsel %vm320_vm2, %v1106_v28, %v377_v10 }
 0x28f   : > { %678 = vst.msk [vmem:[%s224_s29 + $0x20] sm:$0xff] %vm239_vm0, %v483_v11 }
 0x290   : > { %384 = vst.msk [vmem:[%s224_s29] sm:$0xff] %vm239_vm0, %v382_v12 }
 0x29b   : > { %v429_v13 = vpop.permute.xlu1 %428 }
 0x29c   : > { %v433_v14 = vsel %vm1179_vm4, %v1132_v35, %v429_v13 }
 0x29d   : > { %675 = vst.msk [vmem:[%s224_s29 + $0x18] sm:$0xff] %vm239_vm0, %v433_v14 }
 0x2a3   : > { %v529_v15 = vpop.permute.xlu1 %528 }
 0x2a4   : > { %v534_v16 = vsel %vm320_vm2, %v1116_v31, %v529_v15 }
 0x2a5   : > { %682 = vst.msk [vmem:[%s224_s29 + $0x30] sm:$0xff] %vm239_vm0, %v534_v16 }
 0x2ab   : > { %v531_v17 = vpop.permute.xlu2 %530 }
 0x2ac   : > { %v535_v18 = vsel %vm1179_vm4, %v1126_v34, %v531_v17 }
 0x2ad   : > { %683 = vst.msk [vmem:[%s224_s29 + $0x38] sm:$0xff] %vm239_vm0, %v535_v18 }
 0x2bb   : > { %v427_v19 = vpop.permute.xlu0 %426 }
 0x2bc   : > { %v432_v20 = vsel %vm320_vm2, %v1122_v33, %v427_v19 }
 0x2bd   : > { %674 = vst.msk [vmem:[%s224_s29 + $0x10] sm:$0xff] %vm239_vm0, %v432_v20 }
 0x2c3   : > { %v480_v21 = vpop.permute.xlu0 %479 }
 0x2c4   : > { %v484_v22 = vsel %vm1179_vm4, %v1118_v32, %v480_v21 }
 0x2c5   : > { %679 = vst.msk [vmem:[%s224_s29 + $0x28] sm:$0xff] %vm239_vm0, %v484_v22 }
 0x2c6   : > { %889 = shalt.err (!%p886_p10)
}
 0x2c7   : > { %s941_s11 = smov 128   ;;  %s942_s5 = smov 8  }
 0x2c8   : > { %708 = dma.vmem_to_hbm [thread:$0]  (%p1035_p3), %s554_s4, 1024, %s556_s7, %s540_s16, %s941_s11, %s941_s11, %s942_s5  }
 0x2c9 PF: > { %s570_s18 = sand.u32 1, %s920_s12   ;;  %p1257_p12 = scmp.ge.s32.totalorder %s932_s15, 2 }
 0x2ca   : > { %s571_s23 = scalar_lea.sflag [#allocation5], %s570_s18 }
 0x2cb   : > { %p722_p13 = pnand %p1257_p12, %p998_p6 }
 0x2cd   : > { %p723_p0 = pneg %p722_p13 }
 0x2cf   : > { %915 = dma.done.wait (%p723_p0), %s571_s23, 1024  }
 0x2d0   : > { %917 = vsyncadd (%p723_p0), %s571_s23, 4294966272  ;;  %p17_p5 = scmp.ge.s32.totalorder %s1025_s6, 4   ;;  %s1258_s12 = smov %s924_s13 }
 0x2d1   : > { %s1259_s13 = smov %s928_s14  ;;  %s1260_s14 = smov %s1041_s10 }
 0x2d2   : > { %s1261_s15 = smov %s1025_s6  ;;  %19 = sbr.rel (!%p17_p5) target bundleno = 6 (0x6), region = 91 }
 0x2d7   :  { %577 = vsyncpa [#allocation4], 1 }
 0x2d8   :  { %579 = vsyncpa [#allocation4 + $0x1], 1 }
 0x2d9   :  { %580 = vsyncpa [#allocation7], 1 }
 0x2da   :  { %581 = vsyncpa [#allocation5], 1 }
 0x2db   :  { %583 = vsyncpa [#allocation5 + $0x1], 1 }

</bundles_post_ra>
